<compile_context>
chip_gen: v7x
topology: tpu7x:2x2x1
jax: 0.10.0
libtpu: 0.0.40
codegen_flags: <defaults>
</compile_context>

<pallas_src>
import jax
import jax.numpy as jnp
from jax.experimental import pallas as pl
from jax.experimental.pallas import tpu as pltpu

_EPS = 1e-5
_LANE = 128


def custom_head_kernel(x_ref, w1_ref, b1_ref, w2_ref, b2_ref, o_ref):
    # x_ref: (TN, C, HW) float32, native layout (HW on lanes, C on sublanes).
    x = x_ref[...]
    hw = x.shape[-1]
    xmax = jnp.max(x, axis=-1)                       # (TN, C) adaptive max pool (1,1)
    xmean = jnp.sum(x, axis=-1) * (1.0 / hw)         # (TN, C) adaptive avg pool, f32 mean

    # fastai AdaptiveConcatPool2d order: [max, avg]; cast to bf16 for the MXU.
    feat = jnp.concatenate([xmax, xmean], axis=-1).astype(jnp.bfloat16)   # (TN, 2C)

    # Linear1 with BN1 folded in (single K=2C matmul), f32 accumulate, + bias.
    z1 = jnp.dot(feat, w1_ref[...], preferred_element_type=jnp.float32) + b1_ref[...]
    z1 = jnp.maximum(z1, 0.0).astype(jnp.bfloat16)   # ReLU (BN2 folded into w2/b2)

    # Linear2 (+BN2 fold) + Tanh; output dim pre-padded to a multiple of 128.
    z2 = jnp.dot(z1, w2_ref[...], preferred_element_type=jnp.float32) + b2_ref[...]
    o_ref[...] = jnp.tanh(z2)


def _vmem_capacity_bytes():
    try:
        cap = getattr(pltpu.get_tpu_info(), "vmem_capacity_bytes", None)
        if cap:
            return int(cap)
    except Exception:
        pass
    return 64 << 20  # conservative (v7x per-TC)


def _choose_batch_tile(N, HW, C, x_budget_bytes):
    """Pick a batch tile: double-buffered f32 x tile within budget, and keep
    >=2 grid steps when the batch allows so v7x megacore can shard the grid."""
    if N <= 8:
        return N
    per_row = C * HW * 4                              # f32 bytes per sample
    tn = x_budget_bytes // max(1, 2 * per_row)        # double-buffered input tile
    tn = max(8, min(int(tn), 1024))
    tn = (tn // 8) * 8                                # sublane-friendly output tiles
    half = -(-N // 2)                                 # cdiv(N, 2)
    cap = ((half + 7) // 8) * 8                       # force grid >= 2 (v7x megacore)
    return max(8, min(tn, cap))


def custom_head_forward(x_nchw, folded_params, out_features, batch_tile=None):
    """x_nchw: (N, C, H, W) float32; folded_params from fold_params()."""
    N, C, H, W = x_nchw.shape
    HW = H * W
    w1f, b1f, w2f, b2f = folded_params
    C2, H1 = w1f.shape
    Opad = w2f.shape[1]

    # Native layout: contiguous merge of (H, W) -> HW is a free reshape (no HBM pass).
    x = x_nchw.reshape(N, C, HW)

    vmem_cap = _vmem_capacity_bytes()
    if batch_tile is not None:
        TN = min(int(batch_tile), N)
    else:
        TN = _choose_batch_tile(N, HW, C, x_budget_bytes=vmem_cap // 8)
    grid = (pl.cdiv(N, TN),)

    # VMEM estimate: double-buffered f32 x tile + single-buffered weights/biases
    # + double-buffered f32 output tile, with margin.  Capped relative to the
    # chip's VMEM (~40 MiB on v7x's 64 MiB/TC, ~80 MiB on 128-MiB parts).
    est = (
        2 * TN * C * HW * 4          # x tile, f32, double-buffered
        + C2 * H1 * 2                # w1, bf16, single-buffered
        + H1 * Opad * 2              # w2, bf16, single-buffered
        + (H1 + Opad) * 4            # biases, f32
        + 2 * TN * Opad * 4          # output tile, f32, double-buffered
        + (2 << 20)                  # margin
    )
    vmem_limit = int(min(max(est, 16 << 20), (vmem_cap * 5) // 8))

    out = pl.pallas_call(
        custom_head_kernel,
        out_shape=jax.ShapeDtypeStruct((N, Opad), jnp.float32),
        grid=grid,
        in_specs=[
            pl.BlockSpec((TN, C, HW), lambda i: (i, 0, 0)),   # batch-tiled input
            pl.BlockSpec((C2, H1), lambda i: (0, 0),
                         pipeline_mode=pl.Buffered(1)),        # resident weights
            pl.BlockSpec((1, H1), lambda i: (0, 0),
                         pipeline_mode=pl.Buffered(1)),
            pl.BlockSpec((H1, Opad), lambda i: (0, 0),
                         pipeline_mode=pl.Buffered(1)),
            pl.BlockSpec((1, Opad), lambda i: (0, 0),
                         pipeline_mode=pl.Buffered(1)),
        ],
        out_specs=pl.BlockSpec((TN, Opad), lambda i: (i, 0)),
        compiler_params=pltpu.CompilerParams(
            dimension_semantics=("parallel",),                # v7x: shard batch over 2 TCs
            vmem_limit_bytes=vmem_limit,
        ),
    )(x, w1f, b1f, w2f, b2f)
    return out[:, :out_features]


def init_raw_params(key, C, hidden, out_features):
    """Synthetic parameters matching the PyTorch module shapes (in_features = 2*C)."""
    in_features = 2 * C
    ks = jax.random.split(key, 12)
    raw = dict(
        g1=jax.random.normal(ks[0], (in_features,), jnp.float32) * 0.1 + 1.0,
        b1n=jax.random.normal(ks[1], (in_features,), jnp.float32) * 0.1,
        rm1=jax.random.normal(ks[2], (in_features,), jnp.float32) * 0.1,
        rv1=jax.nn.softplus(jax.random.normal(ks[3], (in_features,), jnp.float32)) + 0.5,
        w1=jax.random.normal(ks[4], (in_features, hidden), jnp.float32) / jnp.sqrt(in_features),
        b1=jax.random.normal(ks[5], (hidden,), jnp.float32) * 0.01,
        g2=jax.random.normal(ks[6], (hidden,), jnp.float32) * 0.1 + 1.0,
        b2n=jax.random.normal(ks[7], (hidden,), jnp.float32) * 0.1,
        rm2=jax.random.normal(ks[8], (hidden,), jnp.float32) * 0.1,
        rv2=jax.nn.softplus(jax.random.normal(ks[9], (hidden,), jnp.float32)) + 0.5,
        w2=jax.random.normal(ks[10], (hidden, out_features), jnp.float32) / jnp.sqrt(hidden),
        b2=jax.random.normal(ks[11], (out_features,), jnp.float32) * 0.01,
    )
    return raw


def fold_params(raw):
    """Fold BN1/BN2 (running-stats, eval mode) into the Linear weights.

    Returns one bf16 (2C, hidden) weight for Linear1 (rows ordered [max|avg] to
    match AdaptiveConcatPool2d), f32 biases, and a lane-padded bf16 Linear2."""
    scale1 = raw["g1"] / jnp.sqrt(raw["rv1"] + _EPS)
    shift1 = raw["b1n"] - raw["rm1"] * scale1
    scale2 = raw["g2"] / jnp.sqrt(raw["rv2"] + _EPS)
    shift2 = raw["b2n"] - raw["rm2"] * scale2

    w1, b1 = raw["w1"], raw["b1"]
    w2, b2 = raw["w2"], raw["b2"]
    hidden = w1.shape[1]
    O = w2.shape[1]

    w1f = scale1[:, None] * w1
    b1f = (b1 + shift1 @ w1).reshape(1, hidden)
    w2f = scale2[:, None] * w2
    b2f = (b2 + shift2 @ w2).reshape(1, O)

    Opad = ((O + _LANE - 1) // _LANE) * _LANE
    w2f = jnp.pad(w2f, ((0, 0), (0, Opad - O)))
    b2f = jnp.pad(b2f, ((0, 0), (0, Opad - O)))

    return (
        w1f.astype(jnp.bfloat16),
        b1f.astype(jnp.float32),
        w2f.astype(jnp.bfloat16),
        b2f.astype(jnp.float32),
    )


def reference_forward_folded(x_nchw, folded, out_features):
    """Pure-JAX reference with the SAME folding / bf16 casts as the kernel."""
    w1f, b1f, w2f, b2f = folded
    N, C, H, W = x_nchw.shape
    x = x_nchw.reshape(N, C, H * W)
    xmax = jnp.max(x, axis=-1)
    xmean = jnp.mean(x, axis=-1)
    feat = jnp.concatenate([xmax, xmean], axis=-1).astype(jnp.bfloat16)
    z1 = jnp.dot(feat, w1f, preferred_element_type=jnp.float32) + b1f
    z1 = jnp.maximum(z1, 0.0).astype(jnp.bfloat16)
    z2 = jnp.dot(z1, w2f, preferred_element_type=jnp.float32) + b2f
    return jnp.tanh(z2)[:, :out_features]


def reference_forward_f32(x_nchw, raw):
    """Full-precision eval-mode reference of the original module (unfolded BN)."""
    N, C, H, W = x_nchw.shape
    x = x_nchw.reshape(N, C, H * W)
    feat = jnp.concatenate([jnp.max(x, axis=-1), jnp.mean(x, axis=-1)], axis=1)  # max first
    scale1 = raw["g1"] / jnp.sqrt(raw["rv1"] + _EPS)
    shift1 = raw["b1n"] - raw["rm1"] * scale1
    z1 = (feat * scale1 + shift1) @ raw["w1"] + raw["b1"]
    z1 = jnp.maximum(z1, 0.0)
    scale2 = raw["g2"] / jnp.sqrt(raw["rv2"] + _EPS)
    shift2 = raw["b2n"] - raw["rm2"] * scale2
    z1 = z1 * scale2 + shift2
    return jnp.tanh(z1 @ raw["w2"] + raw["b2"])


if __name__ == "__main__":
    key = jax.random.PRNGKey(0)
    kx, kp, kx2 = jax.random.split(key, 3)

    # Small shapes: batch=2, conv channels=4, spatial=16x16
    #   -> in_features = 2*4 = 8, hidden = 512, out_features = 10
    N, C, H, W = 2, 4, 16, 16
    hidden, out_features = 512, 10

    x = jax.random.normal(kx, (N, C, H, W), jnp.float32)
    raw = init_raw_params(kp, C, hidden, out_features)
    folded = fold_params(raw)

    y = custom_head_forward(x, folded, out_features)
    y = jax.block_until_ready(y)
    assert y.shape == (N, out_features)

    # Exact-structure check (same folding + bf16 casts, f32 accumulation).
    y_folded = reference_forward_folded(x, folded, out_features)
    assert jnp.allclose(y, y_folded, atol=2e-3, rtol=0.0), "mismatch vs folded bf16 reference"

    # Semantics check against the full-precision eval-mode module (bf16 tolerance).
    y_f32 = reference_forward_f32(x, raw)
    assert jnp.allclose(y, y_f32, atol=1e-1, rtol=0.0), "mismatch vs f32 eval-mode reference"

    # Partial-last-tile / multi-step-grid path: N not divisible by the batch tile.
    N2 = 12
    x2 = jax.random.normal(kx2, (N2, C, H, W), jnp.float32)
    y2 = custom_head_forward(x2, folded, out_features, batch_tile=8)   # grid=(2,), last tile ragged
    y2 = jax.block_until_ready(y2)
    assert y2.shape == (N2, out_features)
    y2_ref = reference_forward_folded(x2, folded, out_features)
    assert jnp.allclose(y2, y2_ref, atol=2e-3, rtol=0.0), "mismatch on partial-tile batch"

    print("KERNEL_OK")
</pallas_src>

<mosaic_0001>
module attributes {stable_mosaic.version = 11 : i64} {
  func.func @custom_head_kernel(%arg0: i32, %arg1: memref<2x4x256xf32, #tpu.memory_space<vmem>>, %arg2: memref<8x512xbf16, #tpu.memory_space<vmem>>, %arg3: memref<1x512xf32, #tpu.memory_space<vmem>>, %arg4: memref<512x128xbf16, #tpu.memory_space<vmem>>, %arg5: memref<1x128xf32, #tpu.memory_space<vmem>>, %arg6: memref<2x128xf32, #tpu.memory_space<vmem>>) attributes {dimension_semantics = [#tpu.dimension_semantics<parallel>], iteration_bounds = array<i64: 1>, scalar_prefetch = 0 : i64, scratch_operands = 0 : i64, tpu.core_type = #tpu.core_type<tc>, window_params = [{transform_indices = @transform_0, window_bounds = array<i64: 2, 4, 256>}, {pipeline_mode = #tpu.pipeline_mode<synchronous>, transform_indices = @transform_1, window_bounds = array<i64: 8, 512>}, {pipeline_mode = #tpu.pipeline_mode<synchronous>, transform_indices = @transform_2, window_bounds = array<i64: 1, 512>}, {pipeline_mode = #tpu.pipeline_mode<synchronous>, transform_indices = @transform_3, window_bounds = array<i64: 512, 128>}, {pipeline_mode = #tpu.pipeline_mode<synchronous>, transform_indices = @transform_4, window_bounds = array<i64: 1, 128>}, {transform_indices = @transform_5, window_bounds = array<i64: 2, 128>}]} {
    %c0 = arith.constant 0 : index
    %c0_0 = arith.constant 0 : index
    %c0_1 = arith.constant 0 : index
    %0 = vector.load %arg1[%c0, %c0_0, %c0_1] : memref<2x4x256xf32, #tpu.memory_space<vmem>>, vector<2x4x256xf32>
    %cst = arith.constant dense<0xFF800000> : vector<2x4xf32>
    %1 = vector.multi_reduction <maximumf>, %0, %cst [2] : vector<2x4x256xf32> to vector<2x4xf32>
    %cst_2 = arith.constant dense<0.000000e+00> : vector<2x4xf32>
    %2 = vector.multi_reduction <add>, %0, %cst_2 [2] : vector<2x4x256xf32> to vector<2x4xf32>
    %cst_3 = arith.constant 3.906250e-03 : f32
    %3 = vector.broadcast %cst_3 : f32 to vector<2x4xf32>
    %4 = arith.mulf %2, %3 : vector<2x4xf32>
    %5 = tpu.concatenate %1, %4 in 1 : vector<2x4xf32>, vector<2x4xf32> -> vector<2x8xf32>
    %6 = arith.truncf %5 : vector<2x8xf32> to vector<2x8xbf16>
    %c0_4 = arith.constant 0 : index
    %c0_5 = arith.constant 0 : index
    %7 = vector.load %arg2[%c0_4, %c0_5] : memref<8x512xbf16, #tpu.memory_space<vmem>>, vector<8x512xbf16>
    %cst_6 = arith.constant dense<0.000000e+00> : vector<2x512xf32>
    %8 = tpu.matmul %6, %7, %cst_6 {dimension_numbers = #tpu.dot_dimension_numbers<[1], [0], [0], [1], [0, 0, 1, 1], [], []>} : vector<2x8xbf16>, vector<8x512xbf16>, vector<2x512xf32> -> vector<2x512xf32>
    %c0_7 = arith.constant 0 : index
    %c0_8 = arith.constant 0 : index
    %9 = vector.load %arg3[%c0_7, %c0_8] : memref<1x512xf32, #tpu.memory_space<vmem>>, vector<1x512xf32>
    %10 = vector.broadcast %9 : vector<1x512xf32> to vector<2x512xf32>
    %11 = arith.addf %8, %10 : vector<2x512xf32>
    %cst_9 = arith.constant 0.000000e+00 : f32
    %12 = vector.broadcast %cst_9 : f32 to vector<2x512xf32>
    %13 = arith.maximumf %11, %12 : vector<2x512xf32>
    %14 = arith.truncf %13 : vector<2x512xf32> to vector<2x512xbf16>
    %c0_10 = arith.constant 0 : index
    %c0_11 = arith.constant 0 : index
    %15 = vector.load %arg4[%c0_10, %c0_11] : memref<512x128xbf16, #tpu.memory_space<vmem>>, vector<512x128xbf16>
    %cst_12 = arith.constant dense<0.000000e+00> : vector<2x128xf32>
    %16 = tpu.matmul %14, %15, %cst_12 {dimension_numbers = #tpu.dot_dimension_numbers<[1], [0], [0], [1], [0, 0, 1, 1], [], []>} : vector<2x512xbf16>, vector<512x128xbf16>, vector<2x128xf32> -> vector<2x128xf32>
    %c0_13 = arith.constant 0 : index
    %c0_14 = arith.constant 0 : index
    %17 = vector.load %arg5[%c0_13, %c0_14] : memref<1x128xf32, #tpu.memory_space<vmem>>, vector<1x128xf32>
    %18 = vector.broadcast %17 : vector<1x128xf32> to vector<2x128xf32>
    %19 = arith.addf %16, %18 : vector<2x128xf32>
    %20 = math.tanh %19 : vector<2x128xf32>
    %c0_15 = arith.constant 0 : index
    %c0_16 = arith.constant 0 : index
    %21 = vector.load %arg6[%c0_15, %c0_16] : memref<2x128xf32, #tpu.memory_space<vmem>>, vector<2x128xf32>
    tpu.vector_store %arg6[%c0_15, %c0_16], %20 {strides = array<i32>} : memref<2x128xf32, #tpu.memory_space<vmem>>, vector<2x128xf32>,
    return
  }
  func.func @transform_0(%arg0: i32) -> (i32, i32, i32) {
    %c0_i32 = arith.constant 0 : i32
    %c0_i32_0 = arith.constant 0 : i32
    %c0_i32_1 = arith.constant 0 : i32
    return %arg0, %c0_i32, %c0_i32_0 : i32, i32, i32
  }
  func.func @transform_1(%arg0: i32) -> (i32, i32) {
    %c0_i32 = arith.constant 0 : i32
    %c0_i32_0 = arith.constant 0 : i32
    %c0_i32_1 = arith.constant 0 : i32
    return %c0_i32, %c0_i32_0 : i32, i32
  }
  func.func @transform_2(%arg0: i32) -> (i32, i32) {
    %c0_i32 = arith.constant 0 : i32
    %c0_i32_0 = arith.constant 0 : i32
    %c0_i32_1 = arith.constant 0 : i32
    return %c0_i32, %c0_i32_0 : i32, i32
  }
  func.func @transform_3(%arg0: i32) -> (i32, i32) {
    %c0_i32 = arith.constant 0 : i32
    %c0_i32_0 = arith.constant 0 : i32
    %c0_i32_1 = arith.constant 0 : i32
    return %c0_i32, %c0_i32_0 : i32, i32
  }
  func.func @transform_4(%arg0: i32) -> (i32, i32) {
    %c0_i32 = arith.constant 0 : i32
    %c0_i32_0 = arith.constant 0 : i32
    %c0_i32_1 = arith.constant 0 : i32
    return %c0_i32, %c0_i32_0 : i32, i32
  }
  func.func @transform_5(%arg0: i32) -> (i32, i32) {
    %c0_i32 = arith.constant 0 : i32
    %c0_i32_0 = arith.constant 0 : i32
    return %arg0, %c0_i32 : i32, i32
  }
}

</mosaic_0001>

<bundles_post_ra>
// kernel: tpu_custom_call.1
= control target key start
LH: loop header
LB: loop body
LE: loop exit
PB: predicated region body
PF: predicated region fallthrough
CT: control target
= control target key end

     0   :  { %10 = vsyncpa [#allocation3], 0  ;;  %s972_s0 = inlined_call_operand.hbm [shape: f32[2,4,256], index: 0, kind: input, shape index: {}]   ;;  %s973_s1 = inlined_call_operand.hbm [shape: bf16[8,512], index: 1, kind: input, shape index: {}]   ;;  %s974_s2 = inlined_call_operand.vmem [shape: f32[1,512], index: 2, kind: input, shape index: {}]   ;;  %s975_s3 = inlined_call_operand.hbm [shape: bf16[512,128], index: 3, kind: input, shape index: {}]   ;;  %s976_s4 = inlined_call_operand.vmem [shape: f32[1,128], index: 4, kind: input, shape index: {}]   ;;  %s977_s5 = inlined_call_operand.hbm [shape: f32[2,128], index: 5, kind: output, shape index: {}]  }
   0x1   :  { %11 = vsyncpa [#allocation6], 0 }
   0x2   :  { %12 = vsyncpa [#allocation4], 0  ;;  %s852_s18 = smov [#allocation5]   ;;  %s853_s20 = smov [#allocation2]  }
   0x3   :  { %s31_s19 = sshll.u32 %s852_s18, 4  ;;  %s18_s21 = sshll.u32 %s853_s20, 4  ;;  %s32_s19 = int_to_ptr.vmem [resolvable:$true] %s31_s19  ;;  %s891_s21 = int_to_ptr.vmem [resolvable:$true] %s18_s21 }
   0x4   :  { %s758_s24 = scalar_lea.hbm %s973_s1, 256 }
   0x5   :  { %p759_p0 = scmp.ne.s32.totalorder %s973_s1, %s758_s24  ;;  %p762_p1 = scmp.lt.u32.totalorder %s758_s24, %s973_s1 }
   0x7   :  { %p764_p2 = pnand %p762_p1, %p759_p0 }
   0x9   :  { %767 = shalt.err (!%p764_p2)
}
   0xa   :  { %s768_s29 = scalar_lea.vmem %s32_s19, 256  ;;  %p773_p4 = scmp.lt.s32.totalorder %s32_s19, %s32_s19 }
   0xb   :  { %p769_p3 = scmp.ne.s32.totalorder %s32_s19, %s768_s29  ;;  %p774_p5 = scmp.lt.s32.totalorder %s768_s29, %s768_s29 }
   0xd   :  { %p775_p6 = por %p774_p5, %p773_p4 }
   0xf   :  { %p776_p7 = pnand %p775_p6, %p769_p3 }
  0x11   :  { %779 = shalt.err (!%p776_p7)
}
  0x12   :  { %34 = dma.hbm_to_vmem [thread:$0]  %s973_s1, 256, %s32_s19, [#allocation6]  }
  0x13   :  { %s780_s9 = scalar_lea.hbm %s972_s0, 256 }
  0x14   :  { %p781_p8 = scmp.ne.s32.totalorder %s972_s0, %s780_s9  ;;  %p784_p9 = scmp.lt.u32.totalorder %s780_s9, %s972_s0 }
  0x16   :  { %p786_p10 = pnand %p784_p9, %p781_p8 }
  0x18   :  { %789 = shalt.err (!%p786_p10)
}
  0x19   :  { %s790_s14 = scalar_lea.vmem %s891_s21, 256  ;;  %p795_p12 = scmp.lt.s32.totalorder %s891_s21, %s891_s21 }
  0x1a   :  { %p791_p11 = scmp.ne.s32.totalorder %s891_s21, %s790_s14  ;;  %p796_p13 = scmp.lt.s32.totalorder %s790_s14, %s790_s14 }
  0x1c   :  { %p797_p0 = por %p796_p13, %p795_p12 }
  0x1e   :  { %p798_p1 = pnand %p797_p0, %p791_p11 }
  0x20   :  { %801 = shalt.err (!%p798_p1)
}
  0x21   :  { %s854_s1 = smov 128   ;;  %s855_s15 = smov 8  }
  0x22   :  { %24 = dma.hbm_to_vmem [thread:$0]  %s972_s0, 256, %s891_s21, [#allocation3], %s854_s1, %s854_s1, %s855_s15  }
  0x23   :  { %s856_s18 = smov [#allocation7]   ;;  %s802_s23 = scalar_lea.hbm %s975_s3, 4096 }
  0x24   :  { %s42_s19 = sshll.u32 %s856_s18, 4  ;;  %p803_p2 = scmp.ne.s32.totalorder %s975_s3, %s802_s23  ;;  %s43_s19 = int_to_ptr.vmem [resolvable:$true] %s42_s19 }
  0x25   :  { %p806_p3 = scmp.lt.u32.totalorder %s802_s23, %s975_s3 }
  0x27   :  { %p808_p4 = pnand %p806_p3, %p803_p2 }
  0x29   :  { %811 = shalt.err (!%p808_p4)
}
  0x2a   :  { %s812_s28 = scalar_lea.vmem %s43_s19, 4096  ;;  %p817_p6 = scmp.lt.s32.totalorder %s43_s19, %s43_s19 }
  0x2b   :  { %p813_p5 = scmp.ne.s32.totalorder %s43_s19, %s812_s28  ;;  %p818_p7 = scmp.lt.s32.totalorder %s812_s28, %s812_s28 }
  0x2d   :  { %p819_p8 = por %p818_p7, %p817_p6 }
  0x2f   :  { %p820_p9 = pnand %p819_p8, %p813_p5 }
  0x31   :  { %823 = shalt.err (!%p820_p9)
}
  0x32   :  { %s857_s0 = smov 64   ;;  %s858_s21 = smov 4  }
  0x33   :  { %48 = dma.hbm_to_vmem [thread:$0]  %s975_s3, 4096, %s43_s19, [#allocation6], %s857_s0, %s857_s0, %s858_s21  }
  0x34   :  { %846 = dma.done.wait [#allocation3], 256  }
  0x35   :  { %847 = vsyncadd [#allocation3], 4294967040 }
  0x36   :  { %848 = dma.done.wait [#allocation6], 4352  }
  0x37   :  { %849 = vsyncadd [#allocation6], 4294962944  ;;  %vm69_vm0 = vcmask 1043456   ;;  %v61_v0 = vld [vmem:[#allocation2] sm:$0xff]  ;;  %v62_v1 = vld [vmem:[#allocation2 + $0x8] sm:$0xff]  ;;  %v859_v24 = vmov 0   ;;  %v94_v27 = vlaneseq }
  0x38   :  { %v65_v2 = vcombine.high %v61_v0, %v61_v0  ;;  %v80_v3 = vsel %vm69_vm0, %v61_v0, 0.0  ;;  %v70_v4 = vsel %vm69_vm0, %v61_v0, -inf  ;;  %v66_v5 = vcombine.high %v62_v1, %v62_v1  ;;  %v123_v16 = vld [vmem:[#allocation5] sm:$0xff]  ;;  %v124_v17 = vld [vmem:[#allocation5 + $0x8] sm:$0xff]  ;;  %205 = vmatprep.mubr.bf16.mxu0 %v859_v24  ;;  %246 = vmatprep.mubr.bf16.mxu1 %v859_v24  ;;  %v724_v25 = vld [vmem:[#allocation7 + $0x40] sm:$0xff]   ;;  %s860_s8 = smov [#allocation8]  }
  0x39   :  { %v85_v6 = vsel %vm69_vm0, %v62_v1, 0.0  ;;  %v75_v7 = vsel %vm69_vm0, %v62_v1, -inf  ;;  %v625_v18 = vcombine.high %v123_v16, %v123_v16  ;;  %v627_v19 = vcombine.high %v124_v17, %v124_v17  ;;  %v725_v26 = vld [vmem:[#allocation7 + $0xc0] sm:$0xff]   ;;  %v728_v49 = vld [vmem:[#allocation7 + $0x48] sm:$0xff]   ;;  %v732_v53 = vld [vmem:[#allocation7 + $0x50] sm:$0xff]   ;;  %s614_s9 = sshll.u32 %s860_s8, 4  ;;  %s615_s9 = int_to_ptr.vmem [resolvable:$true] %s614_s9 }
  0x3a   :  { %v81_v8 = vsel %vm69_vm0, %v65_v2, 0.0  ;;  %v71_v9 = vsel %vm69_vm0, %v65_v2, -inf  ;;  %v86_v10 = vsel %vm69_vm0, %v66_v5, 0.0  ;;  %v76_v11 = vsel %vm69_vm0, %v66_v5, -inf  ;;  %v726_v46 = vld [vmem:[#allocation7] sm:$0xff]   ;;  %v729_v50 = vld [vmem:[#allocation7 + $0xc8] sm:$0xff]   ;;  %p829_p11 = scmp.lt.s32.totalorder %s615_s9, %s615_s9 }
  0x3b   :  { %v82_v12 = vadd.f32 %v81_v8, %v80_v3  ;;  %v72_v13 = vmax.f32 %v70_v4, %v71_v9  ;;  %v87_v14 = vadd.f32 %v86_v10, %v85_v6  ;;  %v77_v15 = vmax.f32 %v75_v7, %v76_v11  ;;  %628 = vmatprep.subr.msk.bf16.mxu0 %vm69_vm0, %v625_v18  ;;  %v727_v47 = vld [vmem:[#allocation7 + $0x80] sm:$0xff]   ;;  %v730_v51 = vld [vmem:[#allocation7 + $0x8] sm:$0xff]   ;;  %v733_v54 = vld [vmem:[#allocation7 + $0xd0] sm:$0xff]   ;;  %s824_s10 = scalar_lea.vmem %s615_s9, 32 }
  0x3c   :  { %v624_v20 = vcombine.low %v123_v16, %v123_v16  ;;  %v626_v21 = vcombine.low %v124_v17, %v124_v17  ;;  %630 = vmatprep.subr.msk.bf16.mxu1 %vm69_vm0, %v627_v19  ;;  %v95_v28 = vand.u32 127, %v94_v27  ;;  %v946_v29 = vshrl.u32 %v94_v27, 7  ;;  %v731_v52 = vld [vmem:[#allocation7 + $0x88] sm:$0xff]   ;;  %v734_v55 = vld [vmem:[#allocation7 + $0x10] sm:$0xff]   ;;  %v736_v57 = vld [vmem:[#allocation7 + $0x58] sm:$0xff]   ;;  %p825_p10 = scmp.ne.s32.totalorder %s615_s9, %s824_s10  ;;  %p830_p12 = scmp.lt.s32.totalorder %s824_s10, %s824_s10 }
  0x3d   :  { %83 = vadd.xlane.f32.xlu0 %v82_v12  ;;  %73 = vmax.xlane.f32.xlu1 %v72_v13  ;;  %vm104_vm1 = vcmask 1041409   ;;  %vm120_vm2 = vcmask 31744   ;;  %vm157_vm3 = vcmask 64512   ;;  %v735_v56 = vld [vmem:[#allocation7 + $0x90] sm:$0xff]   ;;  %v737_v58 = vld [vmem:[#allocation7 + $0xd8] sm:$0xff]   ;;  %v740_v61 = vld [vmem:[#allocation7 + $0x60] sm:$0xff]  }
  0x3e   :  { %v162_v22 = vsel %vm69_vm0, %v624_v20, 0  ;;  %v168_v23 = vsel %vm69_vm0, %v626_v21, 0  ;;  %v109_v30 = vadd.s32 4294967292, %v95_v28  ;;  %v98_v35 = vsub.s32 %v95_v28, %v946_v29  ;;  %v738_v59 = vld [vmem:[#allocation7 + $0x18] sm:$0xff]   ;;  %v741_v62 = vld [vmem:[#allocation7 + $0xe0] sm:$0xff]   ;;  %v744_v1 = vld [vmem:[#allocation7 + $0x68] sm:$0xff]   ;;  %p831_p13 = por %p830_p12, %p829_p11 }
  0x3f   :  { %174 = vmatpush1.bf16.msra.mxu0 %v162_v22  ;;  %215 = vmatpush1.bf16.msra.mxu1 %v168_v23  ;;  %v739_v60 = vld [vmem:[#allocation7 + $0x98] sm:$0xff]   ;;  %v742_v63 = vld [vmem:[#allocation7 + $0x20] sm:$0xff]   ;;  %v745_v2 = vld [vmem:[#allocation7 + $0xe8] sm:$0xff]   ;;  %v129_v13 = vsub.s32 0, %v946_v29  ;;  %v133_v16 = vsub.s32 1, %v946_v29  ;;  %v141_v17 = vsub.s32 3, %v946_v29 }
  0x40   :  { %665 = vmatprep.subr.bf16.mxu0 %v724_v25  ;;  %687 = vmatprep.subr.bf16.mxu1 %v725_v26  ;;  %v112_v33 = vsub.s32 %v109_v30, %v946_v29  ;;  %v743_v0 = vld [vmem:[#allocation7 + $0xa0] sm:$0xff]   ;;  %v746_v3 = vld [vmem:[#allocation7 + $0x28] sm:$0xff]   ;;  %v748_v5 = vld [vmem:[#allocation7 + $0x70] sm:$0xff]   ;;  %p832_p0 = pnand %p831_p13, %p825_p10 }
  0x41   :  { %88 = vadd.xlane.f32.xlu0 %v87_v14  ;;  %78 = vmax.xlane.f32.xlu1 %v77_v15  ;;  %v747_v4 = vld [vmem:[#allocation7 + $0xa8] sm:$0xff]   ;;  %v749_v6 = vld [vmem:[#allocation7 + $0xf0] sm:$0xff]   ;;  %v752_v9 = vld [vmem:[#allocation7 + $0x78] sm:$0xff]   ;;  %v137_v14 = vsub.s32 2, %v946_v29 }
  0x42   :  { %v750_v7 = vld [vmem:[#allocation7 + $0x30] sm:$0xff]   ;;  %v753_v10 = vld [vmem:[#allocation7 + $0xf8] sm:$0xff]   ;;  %v125_v15 = vld [vmem:[%s974_s2] sm:$0xf] }
  0x43   :  { %v751_v8 = vld [vmem:[#allocation7 + $0xb0] sm:$0xff]   ;;  %v754_v11 = vld [vmem:[#allocation7 + $0x38] sm:$0xff]   ;;  %v130_v18 = vrot.slane %v125_v15, %v129_v13  ;;  %v138_v19 = vrot.slane %v125_v15, %v137_v14  ;;  %v134_v20 = vrot.slane %v125_v15, %v133_v16  ;;  %v142_v21 = vrot.slane %v125_v15, %v141_v17 }
  0x44   :  { %v755_v12 = vld [vmem:[#allocation7 + $0xb8] sm:$0xff]  }
  0xca   :  { %v84_v31 = vpop.xlane.xlu0 %83  ;;  %v74_v32 = vpop.xlane.xlu1 %73 }
  0xcb   :  { %v90_v34 = vmul.f32 0.00390625, %v84_v31  ;;  %v99_v41 = vrot.slane %v74_v32, %v98_v35 }
  0xcd   :  { %v113_v40 = vrot.slane %v90_v34, %v112_v33 }
  0xce   :  { %v89_v36 = vpop.xlane.xlu0 %88  ;;  %v79_v37 = vpop.xlane.xlu1 %78 }
  0xcf   :  { %v91_v38 = vmul.f32 0.00390625, %v89_v36  ;;  %v103_v39 = vrot.slane %v79_v37, %v98_v35 }
  0xd1   :  { %v117_v42 = vrot.slane %v91_v38, %v112_v33  ;;  %v105_v44 = vsel %vm104_vm1, %v103_v39, %v99_v41 }
  0xd3   :  { %v118_v43 = vsel %vm104_vm1, %v117_v42, %v113_v40 }
  0xd4   :  { %v121_v45 = vsel %vm120_vm2, %v105_v44, %v118_v43  ;;  %v632_v44 = vld [vmem:[%s976_s4] ss:$0 sm:$0xff] }
  0xd5   :  { %v122_v48 = vpack.c.bf16 %v121_v45, %v121_v45 }
  0xd7   :  { %629 = vmatmul.mubr.msk.bf16.vlgmr.msra.gmra.mrb[0].mxu0 %vm157_vm3, %v122_v48  ;;  %631 = vmatmul.mubr.msk.bf16.vlgmr.msra.gmra.mrb[0].mxu1 %vm157_vm3, %v122_v48 }
  0xd8   :  { %666 = vmatpush3.bf16.msra.mxu0 %v726_v46  ;;  %688 = vmatpush3.bf16.msra.mxu1 %v727_v47 }
  0xd9   :  { %667 = vmatprep.subr.bf16.mxu0 %v728_v49  ;;  %689 = vmatprep.subr.bf16.mxu1 %v729_v50 }
  0xdc   :  { %668 = vmatpush3.bf16.msra.mxu0 %v730_v51  ;;  %690 = vmatpush3.bf16.msra.mxu1 %v731_v52 }
  0xdd   :  { %669 = vmatprep.subr.bf16.mxu0 %v732_v53  ;;  %691 = vmatprep.subr.bf16.mxu1 %v733_v54 }
  0xe0   :  { %670 = vmatpush3.bf16.msra.mxu0 %v734_v55  ;;  %692 = vmatpush3.bf16.msra.mxu1 %v735_v56 }
  0xe1   :  { %671 = vmatprep.subr.bf16.mxu0 %v736_v57  ;;  %693 = vmatprep.subr.bf16.mxu1 %v737_v58 }
  0xe4   :  { %672 = vmatpush3.bf16.msra.mxu0 %v738_v59  ;;  %694 = vmatpush3.bf16.msra.mxu1 %v739_v60 }
  0xe5   :  { %673 = vmatprep.subr.bf16.mxu0 %v740_v61  ;;  %695 = vmatprep.subr.bf16.mxu1 %v741_v62 }
  0xe8   :  { %674 = vmatpush3.bf16.msra.mxu0 %v742_v63  ;;  %696 = vmatpush3.bf16.msra.mxu1 %v743_v0 }
  0xe9   :  { %675 = vmatprep.subr.bf16.mxu0 %v744_v1  ;;  %697 = vmatprep.subr.bf16.mxu1 %v745_v2 }
  0xec   :  { %676 = vmatpush3.bf16.msra.mxu0 %v746_v3  ;;  %698 = vmatpush3.bf16.msra.mxu1 %v747_v4 }
  0xed   :  { %677 = vmatprep.subr.bf16.mxu0 %v748_v5  ;;  %699 = vmatprep.subr.bf16.mxu1 %v749_v6 }
  0xf0   :  { %678 = vmatpush3.bf16.msra.mxu0 %v750_v7  ;;  %700 = vmatpush3.bf16.msra.mxu1 %v751_v8 }
  0xf1   :  { %679 = vmatprep.subr.bf16.mxu0 %v752_v9  ;;  %701 = vmatprep.subr.bf16.mxu1 %v753_v10 }
  0xf4   :  { %680 = vmatpush3.bf16.msra.mxu0 %v754_v11  ;;  %702 = vmatpush3.bf16.msra.mxu1 %v755_v12 }
 0x1aa   :  { %v207_v22 = vpop.f32.mrb[0].mxu0  ;;  %v248_v23 = vpop.f32.mrb[0].mxu1 }
 0x1ab   :  { %v208_v24 = vadd.f32 %v207_v22, %v130_v18  ;;  %v249_v25 = vadd.f32 %v248_v23, %v138_v19  ;;  %v209_v26 = vpop.f32.mrb[1].mxu0  ;;  %v250_v27 = vpop.f32.mrb[1].mxu1 }
 0x1ac   :  { %v210_v28 = vadd.f32 %v209_v26, %v134_v20  ;;  %v251_v30 = vadd.f32 %v250_v27, %v142_v21  ;;  %v211_v31 = vpop.f32.mrb[2].mxu0  ;;  %v252_v32 = vpop.f32.mrb[2].mxu1 }
 0x1ad   :  { %v255_v33 = vmax.f32 %v208_v24, 0.0  ;;  %v257_v34 = vmax.f32 %v249_v25, 0.0  ;;  %v212_v35 = vpop.f32.mrb[3].mxu0  ;;  %v253_v36 = vpop.f32.mrb[3].mxu1 }
 0x1ae   :  { %v256_v37 = vmax.f32 %v210_v28, 0.0  ;;  %v258_v29 = vmax.f32 %v251_v30, 0.0 }
 0x1af   :  { %v259_v40 = vpack.c.bf16 %v255_v33, %v255_v33  ;;  %v261_v41 = vpack.c.bf16 %v257_v34, %v257_v34 }
 0x1b0   :  { %v260_v38 = vpack.c.bf16 %v256_v37, %v256_v37  ;;  %v262_v39 = vpack.c.bf16 %v258_v29, %v258_v29 }
 0x1b2   :  { %558 = vmatprep.mubr.bf16.mxu0 %v260_v38  ;;  %598 = vmatprep.mubr.bf16.mxu1 %v262_v39 }
 0x1b3   :  { %559 = vmatmul.mubr.bf16.vlgmr.msra.gmra.mrb[4].mxu0 %v259_v40  ;;  %599 = vmatmul.mubr.bf16.vlgmr.msra.gmra.mrb[4].mxu1 %v261_v41 }
 0x286   :  { %v681_v42 = vpop.f32.mrb[4].mxu0  ;;  %v703_v43 = vpop.f32.mrb[4].mxu1 }
 0x287   :  { %v682_v45 = vpop.f32.mrb[5].mxu0  ;;  %v704_v46 = vpop.f32.mrb[5].mxu1 }
 0x288   :  { %v683_v47 = vadd.f32 %v682_v45, %v681_v42  ;;  %v705_v48 = vadd.f32 %v704_v46, %v703_v43  ;;  %v684_v49 = vpop.f32.mrb[6].mxu0  ;;  %v706_v50 = vpop.f32.mrb[6].mxu1 }
 0x289   :  { %v685_v51 = vpop.f32.mrb[7].mxu0  ;;  %v707_v52 = vpop.f32.mrb[7].mxu1 }
 0x28a   :  { %v561_v53 = vadd.f32 %v683_v47, %v632_v44 }
 0x28c   :  { %v601_v54 = vadd.f32 %v705_v48, %v561_v53 }
 0x28e   :  { %756 = vtanh.f32 %v601_v54 }
 0x298   :  { %v757_v55 = vpop.eup %756 }
 0x299   :  { %607 = vst [vmem:[#allocation8] sm:$0x3] %v757_v55 }
 0x29a   :  { %835 = shalt.err (!%p832_p0)
}
 0x29b   :  { %s836_s12 = scalar_lea.hbm %s977_s5, 32 }
 0x29c   :  { %p837_p1 = scmp.ne.s32.totalorder %s977_s5, %s836_s12  ;;  %p840_p2 = scmp.lt.u32.totalorder %s836_s12, %s977_s5 }
 0x29e   :  { %p842_p3 = pnand %p840_p2, %p837_p1 }
 0x2a0   :  { %845 = shalt.err (!%p842_p3)
}
 0x2a1   :  { %617 = dma.vmem_to_hbm [thread:$0]  %s615_s9, 32, %s977_s5, [#allocation4]  }
 0x2a2   :  { %850 = dma.done.wait [#allocation4], 32  }
 0x2a3   :  { %851 = vsyncadd [#allocation4], 4294967264 }
 0x2a4   :  { %621 = vsyncpa [#allocation3], 1 }
 0x2a5   :  { %622 = vsyncpa [#allocation6], 1 }
 0x2a6   :  { %623 = vsyncpa [#allocation4], 1 }

</bundles_post_ra>
